<compile_context>
chip_gen: v5e
topology: v5e:2x2
jax: 0.10.0
libtpu: 0.0.40
codegen_flags: <defaults>
</compile_context>

<pallas_src>
import math

import jax
import jax.numpy as jnp
from jax import lax
from jax.experimental import pallas as pl
from jax.experimental.pallas import tpu as pltpu


def _pick_tile(s, candidates):
    """Largest candidate tile that divides s, else the full extent."""
    for t in candidates:
        if s % t == 0:
            return t
    return s


def _qkv_proj_kernel(x_ref, w_in_ref, b_in_ref, q_ref, k_ref, v_ref):
    """Fused QKV projection, channel-major.

    x_ref:    (C, ts)   activations (channel-major slab of the image)
    w_in_ref: (3C, C)   in_proj weight, Q rows pre-scaled by 1/sqrt(C), bf16
    b_in_ref: (3C, 1)   in_proj bias, Q rows pre-scaled, f32
    q/k/v_ref:(C, ts)   bf16 outputs
    """
    c = q_ref.shape[0]
    x = x_ref[...].astype(jnp.bfloat16)                              # (C, ts)
    qkv = jnp.dot(w_in_ref[...], x, preferred_element_type=jnp.float32)
    qkv = qkv + b_in_ref[...]                                        # (3C, ts) f32
    q_ref[...] = qkv[0 * c:1 * c, :].astype(q_ref.dtype)
    k_ref[...] = qkv[1 * c:2 * c, :].astype(k_ref.dtype)
    v_ref[...] = qkv[2 * c:3 * c, :].astype(v_ref.dtype)


def _flash_attn_kernel(q_ref, k_ref, v_ref, xres_ref, w_out_ref, b_out_ref,
                       o_ref, m_sc, l_sc, acc_sc):
    """Online-softmax attention + out_proj + residual, channel-major.

    Grid: (batch, q_tile, kv_tile) with kv innermost ("arbitrary").
    q_ref:    (C, tq)  bf16 (scale already folded into the projection)
    k_ref:    (C, tk)  bf16
    v_ref:    (C, tk)  bf16
    xres_ref: (C, tq)  original activations (residual), f32
    w_out_ref:(C, C)   bf16
    b_out_ref:(C, 1)   f32
    o_ref:    (C, tq)  output block (resident across the kv axis)
    m_sc/l_sc:(1, tq)  running max / denominator, f32
    acc_sc:   (C, tq)  unnormalized output accumulator, f32
    """
    ki = pl.program_id(2)

    @pl.when(ki == 0)
    def _init():
        m_sc[...] = jnp.full_like(m_sc, -jnp.inf)
        l_sc[...] = jnp.zeros_like(l_sc)
        acc_sc[...] = jnp.zeros_like(acc_sc)

    q = q_ref[...]                                                   # (C, tq)
    k = k_ref[...]                                                   # (C, tk)
    v = v_ref[...]                                                   # (C, tk)

    # scores[j, i] = sum_c k[c, j] * q[c, i]   -> (tk, tq), f32 accumulate
    s = lax.dot_general(k, q, (((0,), (0,)), ((), ())),
                        preferred_element_type=jnp.float32)

    m_prev = m_sc[...]                                               # (1, tq)
    m_new = jnp.maximum(m_prev, jnp.max(s, axis=0, keepdims=True))   # (1, tq)
    alpha = jnp.exp(m_prev - m_new)                                  # (1, tq)
    p = jnp.exp(s - m_new)                                           # (tk, tq) f32

    l_sc[...] = alpha * l_sc[...] + jnp.sum(p, axis=0, keepdims=True)
    pv = jnp.dot(v, p.astype(v.dtype),
                 preferred_element_type=jnp.float32)                 # (C, tq)
    acc_sc[...] = acc_sc[...] * alpha + pv
    m_sc[...] = m_new

    @pl.when(ki == pl.num_programs(2) - 1)
    def _finalize():
        inv_l = pl.reciprocal(l_sc[...], approx=True)                # (1, tq)
        attn = (acc_sc[...] * inv_l).astype(w_out_ref.dtype)         # (C, tq) bf16
        out = jnp.dot(w_out_ref[...], attn,
                      preferred_element_type=jnp.float32)            # (C, tq) f32
        out = out + b_out_ref[...] + xres_ref[...].astype(jnp.float32)
        o_ref[...] = out.astype(o_ref.dtype)


def vae_attention_block(x_nchw, params, *, tq=None, tk=None, ts=None):
    """x_nchw: (N, C, H, W) float32. Returns (N, C, H, W)."""
    n, c, h, w = x_nchw.shape
    s = h * w
    x_cs = x_nchw.reshape(n, c, s)        # channel-major; no HBM transpose

    tq = tq or _pick_tile(s, (256, 128))
    tk = tk or _pick_tile(s, (512, 256, 128))
    ts = ts or _pick_tile(s, (512, 256, 128))

    # Fold the 1/sqrt(C) softmax scale into the Q rows of in_proj (trace time).
    scale = 1.0 / math.sqrt(c)
    row_scale = jnp.concatenate(
        [jnp.full((c,), scale, jnp.float32), jnp.ones((2 * c,), jnp.float32)])
    w_in_s = (params["in_proj_w"] * row_scale[:, None]).astype(jnp.bfloat16)
    b_in_s = (params["in_proj_b"] * row_scale)[:, None].astype(jnp.float32)
    w_out = params["out_proj_w"].astype(jnp.bfloat16)                 # (C, C)
    b_out = params["out_proj_b"][:, None].astype(jnp.float32)         # (C, 1)

    # ---- Kernel 1: fused QKV projection (channel-major, bf16 outputs) ----
    q, k, v = pl.pallas_call(
        _qkv_proj_kernel,
        out_shape=(jax.ShapeDtypeStruct((n, c, s), jnp.bfloat16),) * 3,
        grid_spec=pltpu.PrefetchScalarGridSpec(
            num_scalar_prefetch=0,
            grid=(n, s // ts),
            in_specs=[
                pl.BlockSpec((None, c, ts), lambda b, si: (b, 0, si)),
                pl.BlockSpec((3 * c, c), lambda b, si: (0, 0)),
                pl.BlockSpec((3 * c, 1), lambda b, si: (0, 0)),
            ],
            out_specs=[
                pl.BlockSpec((None, c, ts), lambda b, si: (b, 0, si)),
                pl.BlockSpec((None, c, ts), lambda b, si: (b, 0, si)),
                pl.BlockSpec((None, c, ts), lambda b, si: (b, 0, si)),
            ],
        ),
        compiler_params=pltpu.CompilerParams(
            dimension_semantics=("parallel", "parallel")),
    )(x_cs, w_in_s, b_in_s)

    # ---- Kernel 2: flash attention + out_proj + bias + residual ----
    # Per-step VMEM at production sizes (C=512, S=4096, tq=256, tk=512, bf16
    # operands, f32 residual/acc) is ~7 MiB incl. double-buffering — well under
    # the 48 MiB budget requested here (v7x physical VMEM is 64 MiB).
    out_cs = pl.pallas_call(
        _flash_attn_kernel,
        out_shape=jax.ShapeDtypeStruct((n, c, s), x_nchw.dtype),
        grid_spec=pltpu.PrefetchScalarGridSpec(
            num_scalar_prefetch=0,
            grid=(n, s // tq, s // tk),
            in_specs=[
                pl.BlockSpec((None, c, tq), lambda b, qi, ki: (b, 0, qi)),   # q
                pl.BlockSpec((None, c, tk), lambda b, qi, ki: (b, 0, ki)),   # k
                pl.BlockSpec((None, c, tk), lambda b, qi, ki: (b, 0, ki)),   # v
                pl.BlockSpec((None, c, tq), lambda b, qi, ki: (b, 0, qi)),   # residual
                pl.BlockSpec((c, c), lambda b, qi, ki: (0, 0)),              # w_out
                pl.BlockSpec((c, 1), lambda b, qi, ki: (0, 0)),              # b_out
            ],
            out_specs=pl.BlockSpec((None, c, tq), lambda b, qi, ki: (b, 0, qi)),
            scratch_shapes=[
                pltpu.VMEM((1, tq), jnp.float32),    # running max
                pltpu.VMEM((1, tq), jnp.float32),    # running denominator
                pltpu.VMEM((c, tq), jnp.float32),    # output accumulator
            ],
        ),
        compiler_params=pltpu.CompilerParams(
            dimension_semantics=("parallel", "parallel", "arbitrary"),
            vmem_limit_bytes=48 * 1024 * 1024),
    )(q, k, v, x_cs, w_out, b_out)

    return out_cs.reshape(n, c, h, w)


def init_params(key, channels):
    """Deterministic init mirroring the module's __init__ shapes."""
    k1, k2, k3, k4 = jax.random.split(key, 4)
    bound_in = 1.0 / math.sqrt(channels)
    params = {
        # SelfAttention(channels): in_proj Linear(C, 3C), out_proj Linear(C, C)
        "in_proj_w": jax.random.uniform(k1, (3 * channels, channels),
                                        jnp.float32, -bound_in, bound_in),
        "in_proj_b": jax.random.uniform(k2, (3 * channels,),
                                        jnp.float32, -bound_in, bound_in),
        "out_proj_w": jax.random.uniform(k3, (channels, channels),
                                         jnp.float32, -bound_in, bound_in),
        "out_proj_b": jax.random.uniform(k4, (channels,),
                                         jnp.float32, -bound_in, bound_in),
        # TODO(synk): GroupNorm(32, C) exists in __init__ but the provided
        # forward() never applies it, so the params are created and unused.
        "gn_weight": jnp.ones((channels,), jnp.float32),
        "gn_bias": jnp.zeros((channels,), jnp.float32),
    }
    return params


def _reference(x_nchw, params):
    """Pure-JAX reference of the provided forward()."""
    n, c, h, w = x_nchw.shape
    s = h * w
    xt = jnp.transpose(x_nchw.reshape(n, c, s), (0, 2, 1))       # (N, S, C)
    qkv = jnp.einsum("nsc,dc->nsd", xt, params["in_proj_w"],
                     precision=jax.lax.Precision.HIGHEST) + params["in_proj_b"]
    q, k, v = qkv[..., :c], qkv[..., c:2 * c], qkv[..., 2 * c:]
    scores = jnp.einsum("nqc,nkc->nqk", q, k,
                        precision=jax.lax.Precision.HIGHEST) / math.sqrt(c)
    p = jax.nn.softmax(scores, axis=-1)
    attn = jnp.einsum("nqk,nkc->nqc", p, v,
                      precision=jax.lax.Precision.HIGHEST)
    out = jnp.einsum("nsc,dc->nsd", attn, params["out_proj_w"],
                     precision=jax.lax.Precision.HIGHEST) + params["out_proj_b"]
    out = out + xt
    return jnp.transpose(out, (0, 2, 1)).reshape(n, c, h, w)


if __name__ == "__main__":
    key = jax.random.PRNGKey(0)
    kx, kp = jax.random.split(key)

    N, C, H, W = 2, 32, 16, 16                 # small test case, S = 256
    x = jax.random.normal(kx, (N, C, H, W), jnp.float32)
    params = init_params(kp, C)

    # tq=tk=ts=128 so the toy size exercises multi-tile flash accumulation.
    out = jax.block_until_ready(
        vae_attention_block(x, params, tq=128, tk=128, ts=128))

    ref = jax.block_until_ready(_reference(x, params))
    assert out.shape == (N, C, H, W)
    assert jnp.allclose(out, ref, atol=1e-2, rtol=1e-2), float(
        jnp.max(jnp.abs(out - ref)))

    print("KERNEL_OK")
</pallas_src>

<mosaic_0001>
module attributes {stable_mosaic.version = 11 : i64} {
  func.func @_qkv_proj_kernel(%arg0: i32, %arg1: i32, %arg2: memref<1x32x128xf32, #tpu.memory_space<vmem>>, %arg3: memref<96x32xbf16, #tpu.memory_space<vmem>>, %arg4: memref<96x1xf32, #tpu.memory_space<vmem>>, %arg5: memref<1x32x128xbf16, #tpu.memory_space<vmem>>, %arg6: memref<1x32x128xbf16, #tpu.memory_space<vmem>>, %arg7: memref<1x32x128xbf16, #tpu.memory_space<vmem>>) attributes {dimension_semantics = [#tpu.dimension_semantics<parallel>, #tpu.dimension_semantics<parallel>], iteration_bounds = array<i64: 2, 2>, scalar_prefetch = 0 : i64, scratch_operands = 0 : i64, tpu.core_type = #tpu.core_type<tc>, window_params = [{transform_indices = @transform_0, window_bounds = array<i64: 1, 32, 128>}, {pipeline_mode = #tpu.pipeline_mode<synchronous>, transform_indices = @transform_1, window_bounds = array<i64: 96, 32>}, {pipeline_mode = #tpu.pipeline_mode<synchronous>, transform_indices = @transform_2, window_bounds = array<i64: 96, 1>}, {transform_indices = @transform_3, window_bounds = array<i64: 1, 32, 128>}, {transform_indices = @transform_4, window_bounds = array<i64: 1, 32, 128>}, {transform_indices = @transform_5, window_bounds = array<i64: 1, 32, 128>}]} {
    %c0 = arith.constant 0 : index
    %c0_0 = arith.constant 0 : index
    %c0_1 = arith.constant 0 : index
    %0 = vector.load %arg2[%c0, %c0_0, %c0_1] : memref<1x32x128xf32, #tpu.memory_space<vmem>>, vector<1x32x128xf32>
    %1 = vector.shape_cast %0 : vector<1x32x128xf32> to vector<32x128xf32>
    %2 = arith.truncf %1 : vector<32x128xf32> to vector<32x128xbf16>
    %c0_2 = arith.constant 0 : index
    %c0_3 = arith.constant 0 : index
    %3 = vector.load %arg3[%c0_2, %c0_3] : memref<96x32xbf16, #tpu.memory_space<vmem>>, vector<96x32xbf16>
    %cst = arith.constant dense<0.000000e+00> : vector<96x128xf32>
    %4 = tpu.matmul %3, %2, %cst {dimension_numbers = #tpu.dot_dimension_numbers<[1], [0], [0], [1], [0, 0, 1, 1], [], []>} : vector<96x32xbf16>, vector<32x128xbf16>, vector<96x128xf32> -> vector<96x128xf32>
    %c0_4 = arith.constant 0 : index
    %c0_5 = arith.constant 0 : index
    %5 = vector.load %arg4[%c0_4, %c0_5] : memref<96x1xf32, #tpu.memory_space<vmem>>, vector<96x1xf32>
    %6 = vector.broadcast %5 : vector<96x1xf32> to vector<96x128xf32>
    %7 = arith.addf %4, %6 : vector<96x128xf32>
    %8 = vector.extract_strided_slice %7 {offsets = [0, 0], sizes = [32, 128], strides = [1, 1]} : vector<96x128xf32> to vector<32x128xf32>
    %9 = arith.truncf %8 : vector<32x128xf32> to vector<32x128xbf16>
    %c0_6 = arith.constant 0 : index
    %c0_7 = arith.constant 0 : index
    %c0_8 = arith.constant 0 : index
    %10 = vector.load %arg5[%c0_6, %c0_7, %c0_8] : memref<1x32x128xbf16, #tpu.memory_space<vmem>>, vector<1x32x128xbf16>
    %11 = vector.shape_cast %10 : vector<1x32x128xbf16> to vector<32x128xbf16>
    %12 = vector.shape_cast %9 : vector<32x128xbf16> to vector<1x32x128xbf16>
    tpu.vector_store %arg5[%c0_6, %c0_7, %c0_8], %12 {strides = array<i32>} : memref<1x32x128xbf16, #tpu.memory_space<vmem>>, vector<1x32x128xbf16>,
    %13 = vector.extract_strided_slice %7 {offsets = [32, 0], sizes = [32, 128], strides = [1, 1]} : vector<96x128xf32> to vector<32x128xf32>
    %14 = arith.truncf %13 : vector<32x128xf32> to vector<32x128xbf16>
    %c0_9 = arith.constant 0 : index
    %c0_10 = arith.constant 0 : index
    %c0_11 = arith.constant 0 : index
    %15 = vector.load %arg6[%c0_9, %c0_10, %c0_11] : memref<1x32x128xbf16, #tpu.memory_space<vmem>>, vector<1x32x128xbf16>
    %16 = vector.shape_cast %15 : vector<1x32x128xbf16> to vector<32x128xbf16>
    %17 = vector.shape_cast %14 : vector<32x128xbf16> to vector<1x32x128xbf16>
    tpu.vector_store %arg6[%c0_9, %c0_10, %c0_11], %17 {strides = array<i32>} : memref<1x32x128xbf16, #tpu.memory_space<vmem>>, vector<1x32x128xbf16>,
    %18 = vector.extract_strided_slice %7 {offsets = [64, 0], sizes = [32, 128], strides = [1, 1]} : vector<96x128xf32> to vector<32x128xf32>
    %19 = arith.truncf %18 : vector<32x128xf32> to vector<32x128xbf16>
    %c0_12 = arith.constant 0 : index
    %c0_13 = arith.constant 0 : index
    %c0_14 = arith.constant 0 : index
    %20 = vector.load %arg7[%c0_12, %c0_13, %c0_14] : memref<1x32x128xbf16, #tpu.memory_space<vmem>>, vector<1x32x128xbf16>
    %21 = vector.shape_cast %20 : vector<1x32x128xbf16> to vector<32x128xbf16>
    %22 = vector.shape_cast %19 : vector<32x128xbf16> to vector<1x32x128xbf16>
    tpu.vector_store %arg7[%c0_12, %c0_13, %c0_14], %22 {strides = array<i32>} : memref<1x32x128xbf16, #tpu.memory_space<vmem>>, vector<1x32x128xbf16>,
    return
  }
  func.func @transform_0(%arg0: i32, %arg1: i32) -> (i32, i32, i32) {
    %c0_i32 = arith.constant 0 : i32
    %c0_i32_0 = arith.constant 0 : i32
    return %arg0, %c0_i32, %arg1 : i32, i32, i32
  }
  func.func @transform_1(%arg0: i32, %arg1: i32) -> (i32, i32) {
    %c0_i32 = arith.constant 0 : i32
    %c0_i32_0 = arith.constant 0 : i32
    %c0_i32_1 = arith.constant 0 : i32
    return %c0_i32, %c0_i32_0 : i32, i32
  }
  func.func @transform_2(%arg0: i32, %arg1: i32) -> (i32, i32) {
    %c0_i32 = arith.constant 0 : i32
    %c0_i32_0 = arith.constant 0 : i32
    %c0_i32_1 = arith.constant 0 : i32
    return %c0_i32, %c0_i32_0 : i32, i32
  }
  func.func @transform_3(%arg0: i32, %arg1: i32) -> (i32, i32, i32) {
    %c0_i32 = arith.constant 0 : i32
    %c0_i32_0 = arith.constant 0 : i32
    return %arg0, %c0_i32, %arg1 : i32, i32, i32
  }
  func.func @transform_4(%arg0: i32, %arg1: i32) -> (i32, i32, i32) {
    %c0_i32 = arith.constant 0 : i32
    %c0_i32_0 = arith.constant 0 : i32
    return %arg0, %c0_i32, %arg1 : i32, i32, i32
  }
  func.func @transform_5(%arg0: i32, %arg1: i32) -> (i32, i32, i32) {
    %c0_i32 = arith.constant 0 : i32
    %c0_i32_0 = arith.constant 0 : i32
    return %arg0, %c0_i32, %arg1 : i32, i32, i32
  }
}

</mosaic_0001>

<bundles_post_ra>
// kernel: tpu_custom_call.1
= control target key start
LH: loop header
LB: loop body
LE: loop exit
PB: predicated region body
PF: predicated region fallthrough
CT: control target
= control target key end

     0   :  { %s1376_s0 = inlined_call_operand.vmem [shape: f32[2,32,256], index: 0, kind: input, shape index: {}]   ;;  %s1377_s1 = inlined_call_operand.vmem [shape: bf16[96,32], index: 1, kind: input, shape index: {}]   ;;  %s1378_s2 = inlined_call_operand.vmem [shape: f32[96,1], index: 2, kind: input, shape index: {}]   ;;  %s1379_s3 = inlined_call_operand.hbm [shape: bf16[2,32,256], index: 3, kind: output, shape index: {0}]   ;;  %s1380_s4 = inlined_call_operand.hbm [shape: bf16[2,32,256], index: 4, kind: output, shape index: {1}]   ;;  %s1381_s5 = inlined_call_operand.hbm [shape: bf16[2,32,256], index: 5, kind: output, shape index: {2}]  }
   0x1   :  { %1390 = sst [smem:[#allocation10_spill]] %s1376_s0 }
   0x2   :  { %1391 = sst [smem:[#allocation11_spill]] %s1377_s1 }
   0x3   :  { %1392 = sst [smem:[#allocation12_spill]] %s1378_s2 }
   0x4   :  { %11 = vsyncpa [#allocation4], 0 }
   0x5   :  { %13 = vsyncpa [#allocation4 + $0x1], 0 }
   0x6   :  { %14 = vsyncpa [#allocation6], 0 }
   0x7   :  { %16 = vsyncpa [#allocation6 + $0x1], 0  ;;  %s1102_s18 = smov 0   ;;  %s1104_s19 = smov 0  }
   0x8   :  { %s1106_s20 = smov 0   ;;  %s1108_s21 = smov 0  }
   0x9   :  { %s1110_s22 = smov 0   ;;  %s1112_s23 = smov 0  }
   0xa   :  { %s1114_s24 = smov 0   ;;  %s1116_s25 = smov 0  }
   0xb LB: > { %s1383_s26 = sadd.s32 4294967295, %s1066_s25   ;;  %s1382_s27 = sadd.s32 4294967294, %s1066_s25   ;;  %s1066_s25 = sphi %s1116_s25, %s22_s25   ;;  %s1062_s24 = sphi %s1114_s24, %s1410_s24   ;;  %s1058_s23 = sphi %s1112_s23, %s1409_s23   ;;  %s1054_s22 = sphi %s1110_s22, %s1408_s22   ;;  %s1050_s21 = sphi %s1108_s21, %s1407_s21   ;;  %s1046_s20 = sphi %s1106_s20, %s1406_s20   ;;  %s1042_s19 = sphi %s1104_s19, %s1405_s19   ;;  %s1038_s18 = sphi %s1102_s18, %s1404_s18  }
   0xc   : > { %s31_s28 = sadd.s32 1, %s1058_s23  ;;  %s34_s29 = sadd.s32 1, %s1062_s24 }
   0xd   : > { %p32_p0 = scmp.ge.s32.totalorder %s31_s28, 2  ;;  %p50_p1 = scmp.ne.s32.totalorder %s1046_s20, %s1042_s19 }
   0xe   : > { %p51_p2 = scmp.eq.s32.totalorder %s1066_s25, 0  ;;  %p124_p5 = scmp.eq.s32.totalorder %s1383_s26, 3 }
   0xf   : > { %s1412_s28 = smov (%p32_p0, %s31_s28), 0  ;;  %s1414_s29 = smov (!%p32_p0, %s34_s29), %s1062_s24 }
  0x10   : > { %s39_s30 = ssub.s32 %s1058_s23, %s1412_s28  ;;  %p1154_p3 = por %p51_p2, %p50_p1 }
  0x11   : > { %p36_p4 = scmp.ge.s32.totalorder %s1414_s29, 2  ;;  %p129_p6 = scmp.ne.s32.totalorder %s1042_s19, %s1038_s18 }
  0x12   : > { %p130_p7 = scmp.eq.s32.totalorder %s1382_s27, 3  ;;  %p1166_p8 = por %p124_p5, %p50_p1 }
  0x13   : > { %s1416_s29 = smov (%p36_p4, %s1414_s29), 0  ;;  %s43_s11 = sadd.s32 1, %s1046_s20 }
  0x14   : > { %p1170_p9 = por %p130_p7, %p129_p6  ;;  %s38_s9 = ssub.s32 %s1062_s24, %s1416_s29 }
  0x15   : > { %s40_s10 = sor.u32 %s39_s30, %s38_s9  ;;  %p729_p11 = scmp.ge.s32.totalorder %s1066_s25, 4 }
  0x16   : > { %p41_p10 = scmp.eq.s32.totalorder %s40_s10, 0 }
  0x17   : > { %208 = sbr.rel (%p729_p11) target bundleno = 42 (0x2a), region = 24 }
  0x18   : > { %s1178_s12 = scalar_select %p41_p10, %s1046_s20, %s43_s11  }
  0x1c   : > { %211 = sbr.rel (!%p1154_p3) target bundleno = 42 (0x2a), region = 28  ;;  %s213_s13 = sand.u32 (%p1154_p3), 1, %s1046_s20  }
  0x1d   : > { %s731_s14 = sshll.u32 (%p1154_p3), %s1062_s24, 3  ;;  %s730_s15 = sshll.u32 (%p1154_p3), %s213_s13, 5 }
  0x1e   : > { %s217_s16 = sadd.s32 (%p1154_p3), %s1058_s23, %s731_s14  ;;  %s1396_s0 = sld [smem:[#allocation10_spill]] (%p1154_p3) }
  0x1f   : > { %s732_s17 = sshll.u32 (%p1154_p3), %s217_s16, 3  ;;  %s215_s10 = scalar_lea.vmem (%p1154_p3), [#allocation2], %s730_s15 }
  0x24   : > { %s219_s9 = scalar_lea.vmem %s1396_s0, %s732_s17 }
  0x25   : > { %v254_v0 = vld [vmem:[%s219_s9] sm:$0xff]  ;;  %v256_v1 = vld [vmem:[%s219_s9 + $0x10] sm:$0xff] }
  0x26   : > { %v258_v2 = vld [vmem:[%s219_s9 + $0x20] sm:$0xff]  ;;  %255 = vst [vmem:[%s215_s10] sm:$0xff] %v254_v0  ;;  %v260_v3 = vld [vmem:[%s219_s9 + $0x30] sm:$0xff] }
  0x27   : > { %257 = vst [vmem:[%s215_s10 + $0x8] sm:$0xff] %v256_v1 }
  0x28   : > { %259 = vst [vmem:[%s215_s10 + $0x10] sm:$0xff] %v258_v2 }
  0x29   : > { %261 = vst [vmem:[%s215_s10 + $0x18] sm:$0xff] %v260_v3 }
  0x2a PF: > { %p733_p12 = scmp.ge.s32.totalorder %s1066_s25, 1  ;;  %p266_p13 = scmp.lt.s32.totalorder %s1066_s25, 5 }
  0x2c   : > { %p267_p0 = pnand %p733_p12, %p266_p13 }
  0x2d   : > { %s1397_s2 = sld [smem:[#allocation12_spill]] (!%p267_p0)  ;;  %s1198_s14 = sand.u32 (!%p267_p0), 1, %s1042_s19  }
  0x2e   : > { %270 = sbr.rel (%p267_p0) target bundleno = 238 (0xee), region = 66  ;;  %s734_s15 = sshll.u32 (!%p267_p0), %s1198_s14, 5 }
  0x2f   : > { %s275_s16 = scalar_lea.vmem (!%p267_p0), [#allocation2], %s734_s15  ;;  %s1398_s1 = sld [smem:[#allocation11_spill]] (!%p267_p0) }
  0x30   : > { %s771_s9 = sshll.u32 (!%p267_p0), %s1054_s22, 3  ;;  %s1262_s6 = sshll.u32 (!%p267_p0), %s1198_s14, 4 }
  0x31   : > { %s534_s10 = sadd.s32 (!%p267_p0), %s1050_s21, %s771_s9  ;;  %s295_s22 = scalar_lea.vmem (!%p267_p0), [#allocation3], %s1262_s6 }
  0x32   : > { %s1264_s27 = sshll.u32 (!%p267_p0), %s534_s10, 2  ;;  %s514_s17 = scalar_lea.sflag (!%p267_p0), [#allocation4], %s1198_s14 }
  0x33   : > { %v331_v4 = vld [vmem:[%s1397_s2 + $0x10] sm:$0xff]  ;;  %v329_v5 = vld [vmem:[%s1397_s2] sm:$0xff]  ;;  %v1068_v6 = vmov 0   ;;  %v314_v8 = vld [vmem:[%s275_s16 + $0x18] sm:$0xff]  ;;  %vm431_vm0 = vcmask 261120   ;;  %s536_s15 = scalar_lea.hbm %s1379_s3, %s1264_s27  ;;  %s932_s13 = scalar_lea.hbm %s1379_s3, 64 }
  0x34   : > { %910 = vset.pattern.permute.xlu1 %v1068_v6  ;;  %909 = vset.pattern.permute.xlu0 %v1068_v6  ;;  %v313_v7 = vld [vmem:[%s275_s16 + $0x10] sm:$0xff]  ;;  %v311_v9 = vld [vmem:[%s275_s16] sm:$0xff]  ;;  %v312_v11 = vld [vmem:[%s275_s16 + $0x8] sm:$0xff]  ;;  %s537_s16 = sshll.u32 %s295_s22, 4  ;;  %s1273_s21 = sshll.u32 %s536_s15, 4  ;;  %s1275_s16 = int_to_ptr.vmem [resolvable:$true] %s537_s16  ;;  %s540_s21 = int_to_ptr.hbm [resolvable:$true] %s1273_s21 }
  0x35   : > { %353 = vperm.xlu1 %910, %v331_v4   ;;  %343 = vperm.xlu0 %909, %v329_v5   ;;  %v316_v10 = vpack.c.bf16 %v314_v8, %v313_v7  ;;  %v333_v12 = vld [vmem:[%s1397_s2 + $0x20] sm:$0xff]  ;;  %v315_v13 = vpack.c.bf16 %v312_v11, %v311_v9  ;;  %v780_v15 = vld [vmem:[%s1398_s1 + $0x8] sm:$0xff]  ;;  %v332_v16 = vld [vmem:[%s1397_s2 + $0x18] sm:$0xff]  ;;  %s926_s30 = sshra.s32 %s540_s21, 4  ;;  %s927_s30 = int_to_ptr.hbm [resolvable:$true] %s926_s30 }
  0x36   : > { %911 = vset.pattern.permute.xlu2 %v1068_v6  ;;  %v779_v14 = vld [vmem:[%s1398_s1] sm:$0xff]  ;;  %v330_v17 = vld [vmem:[%s1397_s2 + $0x8] sm:$0xff]  ;;  %v782_v18 = vld [vmem:[%s1398_s1 + $0x18] sm:$0xff]  ;;  %s928_s9 = scalar_lea.hbm %s927_s30, 16  ;;  %p933_p4 = scmp.lt.s32.totalorder %s927_s30, %s1379_s3 }
  0x37   : > { %456 = vmatpush.bf16.msra.mxu0 %v316_v10  ;;  %818 = vmatpush.bf16.msra.mxu1 %v316_v10  ;;  %v784_v19 = vld [vmem:[%s1398_s1 + $0x28] sm:$0xff]  ;;  %v336_v21 = vld [vmem:[%s1397_s2 + $0x38] sm:$0xff]  ;;  %v335_v22 = vld [vmem:[%s1397_s2 + $0x30] sm:$0xff]  ;;  %p929_p1 = scmp.ne.s32.totalorder %s927_s30, %s928_s9  ;;  %p934_p5 = scmp.lt.s32.totalorder %s932_s13, %s928_s9 }
  0x38   : > { %819 = vmatpush.bf16.msra.mxu2 %v316_v10  ;;  %820 = vmatpush.bf16.msra.mxu3 %v316_v10  ;;  %v334_v20 = vld [vmem:[%s1397_s2 + $0x28] sm:$0xff]  ;;  %v337_v23 = vld [vmem:[%s1397_s2 + $0x40] sm:$0xff]  ;;  %v781_v24 = vld [vmem:[%s1398_s1 + $0x10] sm:$0xff] }
  0x39   : > { %363 = vperm.xlu2 %911, %v333_v12   ;;  %v339_v25 = vld [vmem:[%s1397_s2 + $0x50] sm:$0xff]  ;;  %v338_v26 = vld [vmem:[%s1397_s2 + $0x48] sm:$0xff]  ;;  %v783_v27 = vld [vmem:[%s1398_s1 + $0x20] sm:$0xff]  ;;  %p930_p2 = pnand %p929_p1, %p1166_p8  ;;  %p935_p6 = por %p934_p5, %p933_p4 }
  0x3a   : > { %v340_v28 = vld [vmem:[%s1397_s2 + $0x58] sm:$0xff] }
  0x3b   : > { %457 = vmatpush.bf16.msra.mxu0 %v315_v13  ;;  %821 = vmatpush.bf16.msra.mxu1 %v315_v13  ;;  %p931_p3 = pneg %p930_p2 }
  0x3c   : > { %822 = vmatpush.bf16.msra.mxu2 %v315_v13  ;;  %823 = vmatpush.bf16.msra.mxu3 %v315_v13 }
  0x3d   : > { %358 = vperm.xlu1 %910, %v332_v16   ;;  %348 = vperm.xlu0 %909, %v330_v17   ;;  %p936_p7 = pnand %p935_p6, %p931_p3 }
  0x3e   : > { %762 = vmatmul.msk.bf16.vlgmr.msra.gmra.mxu0 %vm431_vm0, %v779_v14  ;;  %763 = vmatmul.msk.bf16.vlgmr.msra.gmra.mxu1 %vm431_vm0, %v780_v15 }
  0x3f   : > { %765 = vmatmul.msk.bf16.vlgmr.msra.gmra.mxu2 %vm431_vm0, %v782_v18  ;;  %767 = vmatmul.msk.bf16.vlgmr.msra.gmra.mxu3 %vm431_vm0, %v784_v19 }
  0x41   : > { %368 = vperm.xlu2 %911, %v334_v20  }
  0x45   : > { %378 = vperm.xlu1 %910, %v336_v21   ;;  %373 = vperm.xlu0 %909, %v335_v22  }
  0x49   : > { %383 = vperm.xlu2 %911, %v337_v23  }
  0x4d   : > { %393 = vperm.xlu1 %910, %v339_v25   ;;  %388 = vperm.xlu0 %909, %v338_v26  }
  0x4e   : > { %764 = vmatmul.msk.bf16.gmra.mxu1 %vm431_vm0, %v781_v24 }
  0x4f   : > { %766 = vmatmul.msk.bf16.gmra.mxu2 %vm431_vm0, %v783_v27 }
  0x51   : > { %398 = vperm.xlu2 %911, %v340_v28  }
  0x93   : > { %v1255_v30 = vpop.permute.xlu2 %363 }
  0x9b   : > { %v1257_v33 = vpop.permute.xlu2 %368 }
  0xa3   : > { %v1266_v38 = vpop.permute.xlu2 %383 }
  0xa7   : > { %v354_v29 = vpop.permute.xlu1 %353  ;;  %v344_v32 = vpop.permute.xlu0 %343 }
  0xab   : > { %v399_v51 = vpop.permute.xlu2 %398 }
  0xaf   : > { %v359_v31 = vpop.permute.xlu1 %358  ;;  %v349_v37 = vpop.permute.xlu0 %348 }
  0xb7   : > { %v379_v36 = vpop.permute.xlu1 %378  ;;  %v374_v50 = vpop.permute.xlu0 %373 }
  0xbb   : > { %v459_v34 = vpop.f32.mrf.mxu0  ;;  %v464_v35 = vpop.f32.mrf.mxu1 }
  0xbc   : > { %v460_v43 = vadd.f32 %v459_v34, %v344_v32  ;;  %v465_v44 = vadd.f32 %v464_v35, %v354_v29 }
  0xbf   : > { %v394_v49 = vpop.permute.xlu1 %393 }
  0xc2   : > { %v474_v39 = vpop.f32.mrf.mxu2  ;;  %v484_v40 = vpop.f32.mrf.mxu3 }
  0xc3   : > { %v461_v41 = vpop.f32.mrf.mxu0  ;;  %v466_v42 = vpop.f32.mrf.mxu1 }
  0xc4   : > { %v462_v45 = vadd.f32 %v461_v41, %v349_v37  ;;  %v467_v46 = vadd.f32 %v466_v42, %v359_v31 }
  0xc6   : > { %v788_v47 = vpack.c.bf16 %v462_v45, %v460_v43  ;;  %v793_v48 = vpack.c.bf16 %v467_v46, %v465_v44 }
  0xc8   : > { %789 = vst [vmem:[%s295_s22] sm:$0xff] %v788_v47  }
  0xc9   : > { %815 = vst [vmem:[%s295_s22 + $0x8] sm:$0xff] %v793_v48  }
  0xca   : > { %v476_v52 = vpop.f32.mrf.mxu2  ;;  %v486_v53 = vpop.f32.mrf.mxu3 }
  0xcb   : > { %939 = shalt.err (!%p936_p7)
}
  0xcc   : > { %s1384_s14 = smov 64   ;;  %s1386_s22 = smov 128   ;;  %v475_v54 = vadd.f32 %v474_v39, %v374_v50  ;;  %v485_v55 = vadd.f32 %v484_v40, %v394_v49  ;;  %v477_v56 = vadd.f32 %v476_v52, %v379_v36  ;;  %v487_v57 = vadd.f32 %v486_v53, %v399_v51  ;;  %v469_v58 = vpop.f32.mrf.mxu1 }
  0xcd   : > { %s1388_s0 = smov 4   ;;  %s302_s26 = scalar_lea.vmem [#allocation5], %s1262_s6  ;;  %v470_v63 = vadd.f32 %v469_v58, %v1255_v30 }
  0xce   : > { %824 = dma.vmem_to_hbm [thread:$0]  (%p1166_p8), %s1275_s16, 256, %s540_s21, %s514_s17, %s1384_s14, %s1386_s22, %s1388_s0   ;;  %v803_v59 = vpack.c.bf16 %v477_v56, %v475_v54  ;;  %v813_v60 = vpack.c.bf16 %v487_v57, %v485_v55 }
  0xcf   : > { %s1295_s30 = scalar_lea.vmem [#allocation7], %s1262_s6  ;;  %s554_s11 = scalar_lea.hbm %s1380_s4, %s1264_s27 }
  0xd0   : > { %816 = vst [vmem:[%s302_s26 + $0x8] sm:$0xff] %v803_v59   ;;  %s555_s16 = sshll.u32 %s302_s26, 4  ;;  %s1399_s21 = sadd.s32 4294967295, %s1066_s25   ;;  %s556_s16 = int_to_ptr.vmem [resolvable:$true] %s555_s16 }
  0xd1   : > { %817 = vst [vmem:[%s1295_s30 + $0x8] sm:$0xff] %v813_v60   ;;  %s1304_s17 = sand.u32 1, %s1399_s21   ;;  %s557_s13 = sshll.u32 %s554_s11, 4  ;;  %s558_s13 = int_to_ptr.hbm [resolvable:$true] %s557_s13 }
  0xd2   : > { %v479_v61 = vpop.f32.mrf.mxu2  ;;  %s572_s9 = scalar_lea.hbm %s1381_s5, %s1264_s27  ;;  %s519_s10 = scalar_lea.sflag [#allocation6], %s1304_s17 }
  0xd3   : > { %s954_s14 = sshra.s32 %s558_s13, 4  ;;  %s960_s0 = scalar_lea.hbm %s1380_s4, 64  ;;  %s955_s14 = int_to_ptr.hbm [resolvable:$true] %s954_s14 }
  0xd4   : > { %v471_v62 = vpop.f32.mrf.mxu1  ;;  %s956_s22 = scalar_lea.hbm %s955_s14, 16  ;;  %p961_p13 = scmp.lt.s32.totalorder %s955_s14, %s1380_s4 }
  0xd5   : > { %v472_v0 = vadd.f32 %v471_v62, %v1257_v33  ;;  %p957_p10 = scmp.ne.s32.totalorder %s955_s14, %s956_s22  ;;  %p962_p0 = scmp.lt.s32.totalorder %s960_s0, %s956_s22 }
  0xd7   : > { %v798_v1 = vpack.c.bf16 %v472_v0, %v470_v63  ;;  %p958_p11 = pnand %p957_p10, %p1166_p8  ;;  %p963_p1 = por %p962_p0, %p961_p13 }
  0xd9   : > { %799 = vst [vmem:[%s302_s26] sm:$0xff] %v798_v1   ;;  %p959_p12 = pneg %p958_p11 }
  0xdb   : > { %p964_p2 = pnand %p963_p1, %p959_p12 }
  0xdd   : > { %967 = shalt.err (!%p964_p2)
}
  0xde   : > { %s1400_s27 = smov 4   ;;  %s1401_s26 = smov 128   ;;  %v389_v2 = vpop.permute.xlu0 %388  ;;  %v481_v3 = vpop.f32.mrf.mxu2  ;;  %v480_v4 = vadd.f32 %v479_v61, %v1266_v38 }
  0xdf   : > { %s1402_s6 = smov 64   ;;  %s573_s15 = sshll.u32 %s1295_s30, 4  ;;  %v482_v5 = vadd.f32 %v481_v3, %v389_v2  ;;  %s574_s15 = int_to_ptr.vmem [resolvable:$true] %s573_s15 }
  0xe0   : > { %825 = dma.vmem_to_hbm [thread:$0]  (%p1166_p8), %s556_s16, 256, %s558_s13, %s519_s10, %s1402_s6, %s1401_s26, %s1400_s27  }
  0xe1   : > { %s575_s1 = sshll.u32 %s572_s9, 4  ;;  %v808_v6 = vpack.c.bf16 %v482_v5, %v480_v4  ;;  %s988_s16 = scalar_lea.hbm %s1381_s5, 64  ;;  %s576_s1 = int_to_ptr.hbm [resolvable:$true] %s575_s1 }
  0xe2   : > { %s982_s0 = sshra.s32 %s576_s1, 4  ;;  %s983_s0 = int_to_ptr.hbm [resolvable:$true] %s982_s0 }
  0xe3   : > { %809 = vst [vmem:[%s1295_s30] sm:$0xff] %v808_v6   ;;  %s984_s2 = scalar_lea.hbm %s983_s0, 16  ;;  %p989_p6 = scmp.lt.s32.totalorder %s983_s0, %s1381_s5 }
  0xe4   : > { %p985_p3 = scmp.ne.s32.totalorder %s983_s0, %s984_s2  ;;  %p990_p7 = scmp.lt.s32.totalorder %s988_s16, %s984_s2 }
  0xe6   : > { %p986_p4 = pnand %p985_p3, %p1166_p8  ;;  %p991_p10 = por %p990_p7, %p989_p6 }
  0xe8   : > { %p987_p5 = pneg %p986_p4 }
  0xea   : > { %p992_p11 = pnand %p991_p10, %p987_p5 }
  0xec   : > { %995 = shalt.err (!%p992_p11)
}
  0xed   : > { %826 = dma.vmem_to_hbm [thread:$0]  (%p1166_p8), %s574_s15, 256, %s576_s1, %s519_s10, %s1402_s6, %s1401_s26, %s1400_s27  }
  0xee PF: > { %p840_p12 = scmp.ge.s32.totalorder %s1066_s25, 2  ;;  %s590_s30 = sand.u32 1, %s1038_s18  }
  0xef   : > { %s591_s11 = scalar_lea.sflag [#allocation4], %s590_s30 }
  0xf0   : > { %p831_p13 = pnand %p840_p12, %p1170_p9 }
  0xf2   : > { %p832_p0 = pneg %p831_p13 }
  0xf4   : > { %1029 = dma.done.wait (%p832_p0), %s591_s11, 256  }
  0xf5   : > { %1031 = vsyncadd (%p832_p0), %s591_s11, 4294967040  ;;  %s1403_s7 = sadd.s32 4294967294, %s1066_s25  }
  0xf6   : > { %s600_s21 = sand.u32 1, %s1403_s7  }
  0xf7   : > { %s601_s0 = scalar_lea.sflag [#allocation6], %s600_s21 }
  0xf8   : > { %1033 = dma.done.wait (%p832_p0), %s601_s0, 512  }
  0xf9   : > { %1035 = vsyncadd (%p832_p0), %s601_s0, 4294966784  ;;  %s22_s25 = sadd.s32 1, %s1066_s25   ;;  %s1404_s18 = smov %s1042_s19 }
  0xfa   : > { %p19_p8 = scmp.ge.s32.totalorder %s22_s25, 6   ;;  %s1405_s19 = smov %s1046_s20 }
  0xfb   : > { %s1406_s20 = smov %s1178_s12  ;;  %s1407_s21 = smov %s1058_s23 }
  0xfc   : > { %s1408_s22 = smov %s1062_s24  ;;  %s1409_s23 = smov %s1412_s28 }
  0xfd   : > { %s1410_s24 = smov %s1416_s29  ;;  %21 = sbr.rel (!%p19_p8) target bundleno = 11 (0xb), region = 142 }
 0x102   :  { %617 = vsyncpa [#allocation4], 1 }
 0x103   :  { %619 = vsyncpa [#allocation4 + $0x1], 1 }
 0x104   :  { %620 = vsyncpa [#allocation6], 1 }
 0x105   :  { %622 = vsyncpa [#allocation6 + $0x1], 1 }

</bundles_post_ra>
